<compile_context>
chip_gen: v7x
topology: tpu7x:2x2x1
jax: 0.10.0
libtpu: 0.0.40
codegen_flags: <defaults>
</compile_context>

<pallas_src>
import jax
import jax.numpy as jnp
from jax.experimental import pallas as pl
from jax.experimental.pallas import tpu as pltpu

N_SPEAKERS = 2
NUM_RELATIONS = 2 * N_SPEAKERS ** 2          # 8
NUM_BASES = 30
G_DIM, H1_DIM, H2_DIM = 16, 32, 32
NEG_SLOPE = 0.2
DST_TILE = 8                                 # sublane-aligned dst tile for the attention loop


# ---------------------------------------------------------------------------
# Fused kernel: RGCNConv (stacked matmuls) -> GATv2Conv (dst-tiled masked softmax)
# ---------------------------------------------------------------------------
def gatcn_fused_kernel(adj_stk_ref, x_ref, w_stk_ref, root_ref, rbias_ref,
                       wl_ref, bl_ref, wr_ref, br_ref, att_ref, mask_ref,
                       gbias_ref, o_ref):
    x = x_ref[...]                                                        # (N, G)
    n = x.shape[0]

    # ---------------- conv1: RGCN (two stacked MXU calls) ----------------
    # agg[(r,n), g] = sum_s adj[r,n,s] * x[s,g]     -- one (R*N, N) @ (N, G) matmul, M=128
    agg = jnp.dot(adj_stk_ref[...], x, preferred_element_type=jnp.float32)     # (R*N, G)
    # "(r n) g -> n (r g)": sublane-aligned static slices concatenated along the lane axis
    agg_ng = jnp.concatenate(
        [agg[r * n:(r + 1) * n, :] for r in range(NUM_RELATIONS)], axis=1)      # (N, R*G=128)
    h = (jnp.dot(x, root_ref[...], preferred_element_type=jnp.float32)
         + jnp.dot(agg_ng, w_stk_ref[...], preferred_element_type=jnp.float32)  # K = 128
         + rbias_ref[...])                                                       # (N, H1)

    # ---------------- conv2: GATv2 (h stays resident in vregs/VMEM) ----------------
    xl = jnp.dot(h, wl_ref[...], preferred_element_type=jnp.float32) + bl_ref[...]   # (N, H2)
    xr = jnp.dot(h, wr_ref[...], preferred_element_type=jnp.float32) + br_ref[...]   # (N, H2)
    att = att_ref[...]                                                    # (1, H2)
    mask = mask_ref[...]                                                  # (N, N)
    bias = gbias_ref[...]                                                 # (1, H2)

    # dst-tiled attention: DST_TILE destination rows at a time keeps the (T, N, H2)
    # leaky-relu intermediate to a few vregs (scales to larger N without blowing vregs).
    for d0 in range(0, n, DST_TILE):
        xr_t = xr[d0:d0 + DST_TILE, :]                                    # (T, H2)
        m_t = mask[d0:d0 + DST_TILE, :]                                   # (T, N)
        s = xr_t[:, None, :] + xl[None, :, :]                             # (T, N, H2)
        s = jnp.where(s >= 0, s, NEG_SLOPE * s)                           # leaky_relu(., 0.2)
        e = jnp.sum(s * att[None, :, :], axis=-1)                         # (T, N)
        e = jnp.where(m_t > 0, e, jnp.float32(-1e30))
        e_max = jnp.max(e, axis=1, keepdims=True)
        p = jnp.exp(e - e_max)
        p = jnp.where(m_t > 0, p, 0.0)
        # floor guards 0/0 for a dst row with no in-edges (self-loops normally prevent it)
        denom = jnp.maximum(jnp.sum(p, axis=1, keepdims=True), jnp.float32(1e-20))
        alpha = p * pl.reciprocal(denom, approx=True)                     # softmax over src (EUP)
        o_ref[d0:d0 + DST_TILE, :] = (
            jnp.dot(alpha, xl, preferred_element_type=jnp.float32) + bias)
    # NOTE: output is (N, 32) => 32-lane stores; making it lane-dense only pays off once
    # several graphs are batched along the lane/M axis (v6e/v7x MXU-fill item in the review).


def _vmem_spec():
    # Whole array resident in VMEM, no blocking / no pipelining (all operands are tiny).
    return pl.BlockSpec(memory_space=pltpu.MemorySpace.VMEM)


def gatcn_fused(x, adj_stk, w_stk, root, rgcn_bias, wl, bl, wr, br, att, mask, gat_bias):
    n = x.shape[0]
    h2 = wl.shape[1]
    assert n % DST_TILE == 0, "node count must be a multiple of DST_TILE"
    return pl.pallas_call(
        gatcn_fused_kernel,
        out_shape=jax.ShapeDtypeStruct((n, h2), jnp.float32),
        in_specs=[_vmem_spec()] * 12,
        out_specs=_vmem_spec(),
    )(adj_stk, x, w_stk, root, rgcn_bias, wl, bl, wr, br, att, mask, gat_bias)


# ---------------------------------------------------------------------------
# Wrapper-side precompute (hoist these out of the step when graph/params are static)
# ---------------------------------------------------------------------------
def build_graph_structure(edge_index, edge_type, n):
    """Dense per-relation scatter-mean adjacency stacked to (R*N, N) + GATv2 mask."""
    src, dst = edge_index[0], edge_index[1]
    adj = jnp.zeros((NUM_RELATIONS, n, n), jnp.float32).at[edge_type, dst, src].add(1.0)
    adj = adj / jnp.maximum(adj.sum(axis=2, keepdims=True), 1.0)
    adj_stk = adj.reshape(NUM_RELATIONS * n, n)                 # row (r*N + dst)
    mask = jnp.zeros((n, n), jnp.float32).at[dst, src].set(1.0)
    mask = mask.at[jnp.arange(n), jnp.arange(n)].set(1.0)       # add_self_loops=True
    return adj_stk, mask


def build_relation_weights(params):
    """Basis decomposition W_r = sum_b comp[r,b]*basis[b], stacked to (R*G, H1)."""
    w_rel = jnp.einsum("rb,bio->rio", params["comp"], params["basis"])
    return w_rel.reshape(NUM_RELATIONS * G_DIM, H1_DIM)         # row (r*G + g)


def gatcn_forward(params, node_features, edge_index, edge_norm, edge_type):
    del edge_norm  # accepted but unused, matching the PyTorch forward
    n = node_features.shape[0]
    # For a fixed dialogue graph / fixed params these two builds are pure per-call
    # overhead: compute them once outside the step and feed gatcn_fused directly.
    adj_stk, mask = build_graph_structure(edge_index, edge_type, n)
    w_stk = build_relation_weights(params)
    return gatcn_fused(node_features, adj_stk, w_stk,
                       params["root"], params["rgcn_bias"],
                       params["wl"], params["bl"], params["wr"], params["br"],
                       params["att"], mask, params["gat_bias"])


# ---------------------------------------------------------------------------
# Parameters, pure-JAX reference, demo
# ---------------------------------------------------------------------------
def build_params(key):
    ks = jax.random.split(key, 9)
    return {
        "comp":  jax.random.normal(ks[0], (NUM_RELATIONS, NUM_BASES), jnp.float32) * 0.1,
        "basis": jax.random.normal(ks[1], (NUM_BASES, G_DIM, H1_DIM), jnp.float32) * 0.1,
        "root":  jax.random.normal(ks[2], (G_DIM, H1_DIM), jnp.float32) * 0.1,
        "rgcn_bias": jax.random.normal(ks[3], (1, H1_DIM), jnp.float32) * 0.1,
        "wl":  jax.random.normal(ks[4], (H1_DIM, H2_DIM), jnp.float32) * 0.1,
        "bl":  jax.random.normal(ks[5], (1, H2_DIM), jnp.float32) * 0.1,
        "wr":  jax.random.normal(ks[6], (H1_DIM, H2_DIM), jnp.float32) * 0.1,
        "br":  jax.random.normal(ks[7], (1, H2_DIM), jnp.float32) * 0.1,
        "att": jax.random.normal(ks[8], (1, H2_DIM), jnp.float32) * 0.1,
        "gat_bias": jnp.zeros((1, H2_DIM), jnp.float32),
    }


def reference_forward(params, node_features, edge_index, edge_norm, edge_type):
    """Pure-JAX reference with identical semantics (for validation)."""
    del edge_norm
    n = node_features.shape[0]
    src, dst = edge_index[0], edge_index[1]
    adj = jnp.zeros((NUM_RELATIONS, n, n), jnp.float32).at[edge_type, dst, src].add(1.0)
    adj = adj / jnp.maximum(adj.sum(axis=2, keepdims=True), 1.0)
    w_rel = jnp.einsum("rb,bio->rio", params["comp"], params["basis"])
    h = (node_features @ params["root"] + params["rgcn_bias"]
         + jnp.einsum("rij,jd,rdh->ih", adj, node_features, w_rel))

    xl = h @ params["wl"] + params["bl"]
    xr = h @ params["wr"] + params["br"]
    s = xr[:, None, :] + xl[None, :, :]
    s = jnp.where(s >= 0, s, NEG_SLOPE * s)
    e = jnp.sum(s * params["att"][None, :, :], axis=-1)
    mask = jnp.zeros((n, n), jnp.float32).at[dst, src].set(1.0)
    mask = mask.at[jnp.arange(n), jnp.arange(n)].set(1.0)
    e = jnp.where(mask > 0, e, -1e30)
    p = jnp.exp(e - jnp.max(e, axis=1, keepdims=True))
    p = jnp.where(mask > 0, p, 0.0)
    alpha = p / jnp.sum(p, axis=1, keepdims=True)
    return alpha @ xl + params["gat_bias"]


if __name__ == "__main__":
    key = jax.random.PRNGKey(0)
    k_feat, k_norm, k_param = jax.random.split(key, 3)

    N = 16
    node_features = jax.random.normal(k_feat, (N, G_DIM), jnp.float32)

    # deterministic small graph: two directed rings (stride 1 and 3), no self loops,
    # no duplicate edges -> dense formulation matches edge-list semantics exactly
    base = jnp.arange(N, dtype=jnp.int32)
    src = jnp.concatenate([base, base])
    dst = jnp.concatenate([(base + 1) % N, (base + 3) % N]).astype(jnp.int32)
    edge_index = jnp.stack([src, dst])                       # (2, E), E = 32
    edge_type = ((src + dst) % NUM_RELATIONS).astype(jnp.int32)
    edge_norm = jax.random.uniform(k_norm, (edge_index.shape[1],), jnp.float32)

    params = build_params(k_param)

    fwd = jax.jit(gatcn_forward)
    out = fwd(params, node_features, edge_index, edge_norm, edge_type)
    out = jax.block_until_ready(out)

    ref = reference_forward(params, node_features, edge_index, edge_norm, edge_type)
    assert out.shape == (N, H2_DIM)
    # tolerance relaxed slightly vs. before: the softmax uses the EUP approximate
    # reciprocal (pl.reciprocal(..., approx=True)), ~2^-12 relative error.
    assert jnp.allclose(out, ref, rtol=2e-3, atol=2e-3), "mismatch vs reference"

    print("KERNEL_OK")
</pallas_src>

<mosaic_0001>
module attributes {stable_mosaic.version = 11 : i64} {
  func.func private @main(%arg0: i32) attributes {dimension_semantics = [#tpu.dimension_semantics<core_parallel>], iteration_bounds = array<i64: 2>, tpu.core_type = #tpu.core_type<sc_scalar_subcore>, window_params = []} {
    return
  }
}

module attributes {stable_mosaic.version = 11 : i64} {
  func.func private @main(%arg0: i32) attributes {dimension_semantics = [#tpu.dimension_semantics<core_parallel>], iteration_bounds = array<i64: 2>, tpu.core_type = #tpu.core_type<sc_scalar_subcore>, window_params = []} {
    return
  }
}

module attributes {stable_mosaic.version = 11 : i64} {
  func.func @gatcn_fused_kernel(%arg0: memref<128x16xf32, #tpu.memory_space<vmem>>, %arg1: memref<16x16xf32, #tpu.memory_space<vmem>>, %arg2: memref<128x32xf32, #tpu.memory_space<vmem>>, %arg3: memref<16x32xf32, #tpu.memory_space<vmem>>, %arg4: memref<1x32xf32, #tpu.memory_space<vmem>>, %arg5: memref<32x32xf32, #tpu.memory_space<vmem>>, %arg6: memref<1x32xf32, #tpu.memory_space<vmem>>, %arg7: memref<32x32xf32, #tpu.memory_space<vmem>>, %arg8: memref<1x32xf32, #tpu.memory_space<vmem>>, %arg9: memref<1x32xf32, #tpu.memory_space<vmem>>, %arg10: memref<16x16xf32, #tpu.memory_space<vmem>>, %arg11: memref<1x32xf32, #tpu.memory_space<vmem>>, %arg12: memref<16x32xf32, #tpu.memory_space<vmem>>) attributes {dimension_semantics = [], scalar_prefetch = 0 : i64, scratch_operands = 0 : i64, tpu.core_type = #tpu.core_type<tc>} {
    %c0 = arith.constant 0 : index
    %c0_0 = arith.constant 0 : index
    %0 = vector.load %arg1[%c0, %c0_0] : memref<16x16xf32, #tpu.memory_space<vmem>>, vector<16x16xf32>
    %c0_1 = arith.constant 0 : index
    %c0_2 = arith.constant 0 : index
    %1 = vector.load %arg0[%c0_1, %c0_2] : memref<128x16xf32, #tpu.memory_space<vmem>>, vector<128x16xf32>
    %cst = arith.constant dense<0.000000e+00> : vector<128x16xf32>
    %2 = tpu.matmul %1, %0, %cst {dimension_numbers = #tpu.dot_dimension_numbers<[1], [0], [0], [1], [0, 0, 1, 1], [], []>} : vector<128x16xf32>, vector<16x16xf32>, vector<128x16xf32> -> vector<128x16xf32>
    %3 = vector.extract_strided_slice %2 {offsets = [0, 0], sizes = [16, 16], strides = [1, 1]} : vector<128x16xf32> to vector<16x16xf32>
    %4 = vector.extract_strided_slice %2 {offsets = [16, 0], sizes = [16, 16], strides = [1, 1]} : vector<128x16xf32> to vector<16x16xf32>
    %5 = vector.extract_strided_slice %2 {offsets = [32, 0], sizes = [16, 16], strides = [1, 1]} : vector<128x16xf32> to vector<16x16xf32>
    %6 = vector.extract_strided_slice %2 {offsets = [48, 0], sizes = [16, 16], strides = [1, 1]} : vector<128x16xf32> to vector<16x16xf32>
    %7 = vector.extract_strided_slice %2 {offsets = [64, 0], sizes = [16, 16], strides = [1, 1]} : vector<128x16xf32> to vector<16x16xf32>
    %8 = vector.extract_strided_slice %2 {offsets = [80, 0], sizes = [16, 16], strides = [1, 1]} : vector<128x16xf32> to vector<16x16xf32>
    %9 = vector.extract_strided_slice %2 {offsets = [96, 0], sizes = [16, 16], strides = [1, 1]} : vector<128x16xf32> to vector<16x16xf32>
    %10 = vector.extract_strided_slice %2 {offsets = [112, 0], sizes = [16, 16], strides = [1, 1]} : vector<128x16xf32> to vector<16x16xf32>
    %11 = tpu.concatenate %3, %4, %5, %6, %7, %8, %9, %10 in 1 : vector<16x16xf32>, vector<16x16xf32>, vector<16x16xf32>, vector<16x16xf32>, vector<16x16xf32>, vector<16x16xf32>, vector<16x16xf32>, vector<16x16xf32> -> vector<16x128xf32>
    %c0_3 = arith.constant 0 : index
    %c0_4 = arith.constant 0 : index
    %12 = vector.load %arg3[%c0_3, %c0_4] : memref<16x32xf32, #tpu.memory_space<vmem>>, vector<16x32xf32>
    %cst_5 = arith.constant dense<0.000000e+00> : vector<16x32xf32>
    %13 = tpu.matmul %0, %12, %cst_5 {dimension_numbers = #tpu.dot_dimension_numbers<[1], [0], [0], [1], [0, 0, 1, 1], [], []>} : vector<16x16xf32>, vector<16x32xf32>, vector<16x32xf32> -> vector<16x32xf32>
    %c0_6 = arith.constant 0 : index
    %c0_7 = arith.constant 0 : index
    %14 = vector.load %arg2[%c0_6, %c0_7] : memref<128x32xf32, #tpu.memory_space<vmem>>, vector<128x32xf32>
    %cst_8 = arith.constant dense<0.000000e+00> : vector<16x32xf32>
    %15 = tpu.matmul %11, %14, %cst_8 {dimension_numbers = #tpu.dot_dimension_numbers<[1], [0], [0], [1], [0, 0, 1, 1], [], []>} : vector<16x128xf32>, vector<128x32xf32>, vector<16x32xf32> -> vector<16x32xf32>
    %16 = arith.addf %13, %15 : vector<16x32xf32>
    %c0_9 = arith.constant 0 : index
    %c0_10 = arith.constant 0 : index
    %17 = vector.load %arg4[%c0_9, %c0_10] : memref<1x32xf32, #tpu.memory_space<vmem>>, vector<1x32xf32>
    %18 = vector.broadcast %17 : vector<1x32xf32> to vector<16x32xf32>
    %19 = arith.addf %16, %18 : vector<16x32xf32>
    %c0_11 = arith.constant 0 : index
    %c0_12 = arith.constant 0 : index
    %20 = vector.load %arg5[%c0_11, %c0_12] : memref<32x32xf32, #tpu.memory_space<vmem>>, vector<32x32xf32>
    %cst_13 = arith.constant dense<0.000000e+00> : vector<16x32xf32>
    %21 = tpu.matmul %19, %20, %cst_13 {dimension_numbers = #tpu.dot_dimension_numbers<[1], [0], [0], [1], [0, 0, 1, 1], [], []>} : vector<16x32xf32>, vector<32x32xf32>, vector<16x32xf32> -> vector<16x32xf32>
    %c0_14 = arith.constant 0 : index
    %c0_15 = arith.constant 0 : index
    %22 = vector.load %arg6[%c0_14, %c0_15] : memref<1x32xf32, #tpu.memory_space<vmem>>, vector<1x32xf32>
    %23 = vector.broadcast %22 : vector<1x32xf32> to vector<16x32xf32>
    %24 = arith.addf %21, %23 : vector<16x32xf32>
    %c0_16 = arith.constant 0 : index
    %c0_17 = arith.constant 0 : index
    %25 = vector.load %arg7[%c0_16, %c0_17] : memref<32x32xf32, #tpu.memory_space<vmem>>, vector<32x32xf32>
    %cst_18 = arith.constant dense<0.000000e+00> : vector<16x32xf32>
    %26 = tpu.matmul %19, %25, %cst_18 {dimension_numbers = #tpu.dot_dimension_numbers<[1], [0], [0], [1], [0, 0, 1, 1], [], []>} : vector<16x32xf32>, vector<32x32xf32>, vector<16x32xf32> -> vector<16x32xf32>
    %c0_19 = arith.constant 0 : index
    %c0_20 = arith.constant 0 : index
    %27 = vector.load %arg8[%c0_19, %c0_20] : memref<1x32xf32, #tpu.memory_space<vmem>>, vector<1x32xf32>
    %28 = vector.broadcast %27 : vector<1x32xf32> to vector<16x32xf32>
    %29 = arith.addf %26, %28 : vector<16x32xf32>
    %c0_21 = arith.constant 0 : index
    %c0_22 = arith.constant 0 : index
    %30 = vector.load %arg9[%c0_21, %c0_22] : memref<1x32xf32, #tpu.memory_space<vmem>>, vector<1x32xf32>
    %c0_23 = arith.constant 0 : index
    %c0_24 = arith.constant 0 : index
    %31 = vector.load %arg10[%c0_23, %c0_24] : memref<16x16xf32, #tpu.memory_space<vmem>>, vector<16x16xf32>
    %c0_25 = arith.constant 0 : index
    %c0_26 = arith.constant 0 : index
    %32 = vector.load %arg11[%c0_25, %c0_26] : memref<1x32xf32, #tpu.memory_space<vmem>>, vector<1x32xf32>
    %33 = vector.extract_strided_slice %29 {offsets = [0, 0], sizes = [8, 32], strides = [1, 1]} : vector<16x32xf32> to vector<8x32xf32>
    %34 = vector.extract_strided_slice %31 {offsets = [0, 0], sizes = [8, 16], strides = [1, 1]} : vector<16x16xf32> to vector<8x16xf32>
    %35 = vector.shape_cast %33 : vector<8x32xf32> to vector<8x1x32xf32>
    %36 = vector.shape_cast %24 : vector<16x32xf32> to vector<1x16x32xf32>
    %37 = vector.broadcast %35 : vector<8x1x32xf32> to vector<8x16x32xf32>
    %38 = vector.broadcast %36 : vector<1x16x32xf32> to vector<8x16x32xf32>
    %39 = arith.addf %37, %38 : vector<8x16x32xf32>
    %cst_27 = arith.constant 0.000000e+00 : f32
    %40 = vector.broadcast %cst_27 : f32 to vector<8x16x32xf32>
    %41 = arith.cmpf oge, %39, %40 : vector<8x16x32xf32>
    %cst_28 = arith.constant 2.000000e-01 : f32
    %42 = vector.broadcast %cst_28 : f32 to vector<8x16x32xf32>
    %43 = arith.mulf %42, %39 : vector<8x16x32xf32>
    %44 = arith.select %41, %39, %43 : vector<8x16x32xi1>, vector<8x16x32xf32>
    %45 = vector.shape_cast %30 : vector<1x32xf32> to vector<1x1x32xf32>
    %46 = vector.broadcast %45 : vector<1x1x32xf32> to vector<8x16x32xf32>
    %47 = arith.mulf %44, %46 : vector<8x16x32xf32>
    %cst_29 = arith.constant dense<0.000000e+00> : vector<8x16xf32>
    %48 = vector.multi_reduction <add>, %47, %cst_29 [2] : vector<8x16x32xf32> to vector<8x16xf32>
    %cst_30 = arith.constant 0.000000e+00 : f32
    %49 = vector.broadcast %cst_30 : f32 to vector<8x16xf32>
    %50 = arith.cmpf ogt, %34, %49 : vector<8x16xf32>
    %cst_31 = arith.constant -1.000000e+30 : f32
    %51 = vector.broadcast %cst_31 : f32 to vector<8x16xf32>
    %52 = arith.select %50, %48, %51 : vector<8x16xi1>, vector<8x16xf32>
    %cst_32 = arith.constant dense<0xFF800000> : vector<8xf32>
    %53 = vector.multi_reduction <maximumf>, %52, %cst_32 [1] : vector<8x16xf32> to vector<8xf32>
    %54 = vector.shape_cast %53 : vector<8xf32> to vector<8x1xf32>
    %55 = vector.broadcast %54 : vector<8x1xf32> to vector<8x16xf32>
    %56 = arith.subf %52, %55 : vector<8x16xf32>
    %57 = math.exp %56 : vector<8x16xf32>
    %cst_33 = arith.constant 0.000000e+00 : f32
    %58 = vector.broadcast %cst_33 : f32 to vector<8x16xf32>
    %59 = arith.cmpf ogt, %34, %58 : vector<8x16xf32>
    %cst_34 = arith.constant 0.000000e+00 : f32
    %60 = vector.broadcast %cst_34 : f32 to vector<8x16xf32>
    %61 = arith.select %59, %57, %60 : vector<8x16xi1>, vector<8x16xf32>
    %cst_35 = arith.constant dense<0.000000e+00> : vector<8xf32>
    %62 = vector.multi_reduction <add>, %61, %cst_35 [1] : vector<8x16xf32> to vector<8xf32>
    %63 = vector.shape_cast %62 : vector<8xf32> to vector<8x1xf32>
    %cst_36 = arith.constant 9.99999968E-21 : f32
    %64 = vector.broadcast %cst_36 : f32 to vector<8x1xf32>
    %65 = arith.maximumf %63, %64 : vector<8x1xf32>
    %66 = tpu.reciprocal %65 {approx = true} : vector<8x1xf32> -> vector<8x1xf32>
    %67 = vector.broadcast %66 : vector<8x1xf32> to vector<8x16xf32>
    %68 = arith.mulf %61, %67 : vector<8x16xf32>
    %cst_37 = arith.constant dense<0.000000e+00> : vector<8x32xf32>
    %69 = tpu.matmul %68, %24, %cst_37 {dimension_numbers = #tpu.dot_dimension_numbers<[1], [0], [0], [1], [0, 0, 1, 1], [], []>} : vector<8x16xf32>, vector<16x32xf32>, vector<8x32xf32> -> vector<8x32xf32>
    %70 = vector.broadcast %32 : vector<1x32xf32> to vector<8x32xf32>
    %71 = arith.addf %69, %70 : vector<8x32xf32>
    %c0_38 = arith.constant 0 : index
    %c0_39 = arith.constant 0 : index
    %72 = vector.load %arg12[%c0_38, %c0_39] : memref<16x32xf32, #tpu.memory_space<vmem>>, vector<8x32xf32>
    tpu.vector_store %arg12[%c0_38, %c0_39], %71 {strides = array<i32>} : memref<16x32xf32, #tpu.memory_space<vmem>>, vector<8x32xf32>,
    %73 = vector.extract_strided_slice %29 {offsets = [8, 0], sizes = [8, 32], strides = [1, 1]} : vector<16x32xf32> to vector<8x32xf32>
    %74 = vector.extract_strided_slice %31 {offsets = [8, 0], sizes = [8, 16], strides = [1, 1]} : vector<16x16xf32> to vector<8x16xf32>
    %75 = vector.shape_cast %73 : vector<8x32xf32> to vector<8x1x32xf32>
    %76 = vector.shape_cast %24 : vector<16x32xf32> to vector<1x16x32xf32>
    %77 = vector.broadcast %75 : vector<8x1x32xf32> to vector<8x16x32xf32>
    %78 = vector.broadcast %76 : vector<1x16x32xf32> to vector<8x16x32xf32>
    %79 = arith.addf %77, %78 : vector<8x16x32xf32>
    %cst_40 = arith.constant 0.000000e+00 : f32
    %80 = vector.broadcast %cst_40 : f32 to vector<8x16x32xf32>
    %81 = arith.cmpf oge, %79, %80 : vector<8x16x32xf32>
    %cst_41 = arith.constant 2.000000e-01 : f32
    %82 = vector.broadcast %cst_41 : f32 to vector<8x16x32xf32>
    %83 = arith.mulf %82, %79 : vector<8x16x32xf32>
    %84 = arith.select %81, %79, %83 : vector<8x16x32xi1>, vector<8x16x32xf32>
    %85 = vector.shape_cast %30 : vector<1x32xf32> to vector<1x1x32xf32>
    %86 = vector.broadcast %85 : vector<1x1x32xf32> to vector<8x16x32xf32>
    %87 = arith.mulf %84, %86 : vector<8x16x32xf32>
    %cst_42 = arith.constant dense<0.000000e+00> : vector<8x16xf32>
    %88 = vector.multi_reduction <add>, %87, %cst_42 [2] : vector<8x16x32xf32> to vector<8x16xf32>
    %cst_43 = arith.constant 0.000000e+00 : f32
    %89 = vector.broadcast %cst_43 : f32 to vector<8x16xf32>
    %90 = arith.cmpf ogt, %74, %89 : vector<8x16xf32>
    %cst_44 = arith.constant -1.000000e+30 : f32
    %91 = vector.broadcast %cst_44 : f32 to vector<8x16xf32>
    %92 = arith.select %90, %88, %91 : vector<8x16xi1>, vector<8x16xf32>
    %cst_45 = arith.constant dense<0xFF800000> : vector<8xf32>
    %93 = vector.multi_reduction <maximumf>, %92, %cst_45 [1] : vector<8x16xf32> to vector<8xf32>
    %94 = vector.shape_cast %93 : vector<8xf32> to vector<8x1xf32>
    %95 = vector.broadcast %94 : vector<8x1xf32> to vector<8x16xf32>
    %96 = arith.subf %92, %95 : vector<8x16xf32>
    %97 = math.exp %96 : vector<8x16xf32>
    %cst_46 = arith.constant 0.000000e+00 : f32
    %98 = vector.broadcast %cst_46 : f32 to vector<8x16xf32>
    %99 = arith.cmpf ogt, %74, %98 : vector<8x16xf32>
    %cst_47 = arith.constant 0.000000e+00 : f32
    %100 = vector.broadcast %cst_47 : f32 to vector<8x16xf32>
    %101 = arith.select %99, %97, %100 : vector<8x16xi1>, vector<8x16xf32>
    %cst_48 = arith.constant dense<0.000000e+00> : vector<8xf32>
    %102 = vector.multi_reduction <add>, %101, %cst_48 [1] : vector<8x16xf32> to vector<8xf32>
    %103 = vector.shape_cast %102 : vector<8xf32> to vector<8x1xf32>
    %cst_49 = arith.constant 9.99999968E-21 : f32
    %104 = vector.broadcast %cst_49 : f32 to vector<8x1xf32>
    %105 = arith.maximumf %103, %104 : vector<8x1xf32>
    %106 = tpu.reciprocal %105 {approx = true} : vector<8x1xf32> -> vector<8x1xf32>
    %107 = vector.broadcast %106 : vector<8x1xf32> to vector<8x16xf32>
    %108 = arith.mulf %101, %107 : vector<8x16xf32>
    %cst_50 = arith.constant dense<0.000000e+00> : vector<8x32xf32>
    %109 = tpu.matmul %108, %24, %cst_50 {dimension_numbers = #tpu.dot_dimension_numbers<[1], [0], [0], [1], [0, 0, 1, 1], [], []>} : vector<8x16xf32>, vector<16x32xf32>, vector<8x32xf32> -> vector<8x32xf32>
    %110 = vector.broadcast %32 : vector<1x32xf32> to vector<8x32xf32>
    %111 = arith.addf %109, %110 : vector<8x32xf32>
    %c8 = arith.constant 8 : index
    %c0_51 = arith.constant 0 : index
    %112 = vector.load %arg12[%c8, %c0_51] : memref<16x32xf32, #tpu.memory_space<vmem>>, vector<8x32xf32>
    tpu.vector_store %arg12[%c8, %c0_51], %111 {strides = array<i32>} : memref<16x32xf32, #tpu.memory_space<vmem>>, vector<8x32xf32>,
    return
  }
}

</mosaic_0001>

<bundles_post_ra>
// kernel: gatcn_forward.1
= control target key start
LH: loop header
LB: loop body
LE: loop exit
PB: predicated region body
PF: predicated region fallthrough
CT: control target
= control target key end

     0   :  { %vm60_vm0 = vcmask 130048   ;;  %s2429_s0 = inlined_call_operand.vmem [shape: f32[128,16], index: 0, kind: input, shape index: {}]   ;;  %s2430_s1 = inlined_call_operand.vmem [shape: f32[16,16], index: 1, kind: input, shape index: {}]   ;;  %s2431_s2 = inlined_call_operand.vmem [shape: f32[128,32], index: 2, kind: input, shape index: {}]   ;;  %s2432_s3 = inlined_call_operand.vmem [shape: f32[16,32], index: 3, kind: input, shape index: {}]   ;;  %s2433_s4 = inlined_call_operand.vmem [shape: f32[1,32], index: 4, kind: input, shape index: {}]   ;;  %s2434_s5 = inlined_call_operand.vmem [shape: f32[32,32], index: 5, kind: input, shape index: {}]   ;;  %s2435_s6 = inlined_call_operand.vmem [shape: f32[1,32], index: 6, kind: input, shape index: {}]   ;;  %s2436_s7 = inlined_call_operand.vmem [shape: f32[32,32], index: 7, kind: input, shape index: {}]   ;;  %s2437_s8 = inlined_call_operand.vmem [shape: f32[1,32], index: 8, kind: input, shape index: {}]   ;;  %s2438_s9 = inlined_call_operand.vmem [shape: f32[1,32], index: 9, kind: input, shape index: {}]   ;;  %s2439_s10 = inlined_call_operand.vmem [shape: f32[16,16], index: 10, kind: input, shape index: {}]   ;;  %s2440_s11 = inlined_call_operand.vmem [shape: f32[1,32], index: 11, kind: input, shape index: {}]   ;;  %s2441_s12 = inlined_call_operand.hbm [shape: f32[16,32], index: 12, kind: output, shape index: {}]  }
   0x1   :  { %v1960_v0 = vld [vmem:[%s2430_s1] sm:$0xff]  ;;  %v1965_v1 = vld [vmem:[%s2430_s1 + $0x8] sm:$0xff]  ;;  %v46_v5 = vld [vmem:[%s2429_s0 + $0x10] sm:$0xff] }
   0x2   :  { %v44_v2 = vld [vmem:[%s2429_s0] sm:$0xff]  ;;  %v1733_v3 = vpack.c.bf16 %v1965_v1, %v1960_v0  ;;  %v45_v4 = vld [vmem:[%s2429_s0 + $0x8] sm:$0xff] }
   0x3   :  { %1631 = vmatprep.mubr.msk.f32.mxu0 %vm60_vm0, %v44_v2 }
   0x4   :  { %1734 = vmatprep.subr.bf16.mxu0 %v1733_v3 }
   0x5   :  { %1736 = vmatpush3.bf16.msra.mxu0 %v1733_v3 }
   0x6   :  { %17 = vsyncpa [#allocation3], 0  ;;  %v47_v6 = vld [vmem:[%s2429_s0 + $0x18] sm:$0xff]  ;;  %v48_v7 = vld [vmem:[%s2429_s0 + $0x20] sm:$0xff]  ;;  %s1878_s19 = smov 16   ;;  %s1879_s27 = smov 32  }
   0x7   :  { %v49_v8 = vld [vmem:[%s2429_s0 + $0x28] sm:$0xff]  ;;  %v50_v9 = vld [vmem:[%s2429_s0 + $0x30] sm:$0xff]  ;;  %v51_v10 = vld [vmem:[%s2429_s0 + $0x38] sm:$0xff]  ;;  %s1880_s13 = smov 48   ;;  %s1881_s14 = smov 64   ;;  %vm312_vm1 = vcmask 261120  }
   0x8   :  { %1632 = vmatmul.mubr.msk.f32.vlgmr.msra.gmra.mrb[0].mxu0 %vm60_vm0, %v45_v4  ;;  %v52_v11 = vld [vmem:[%s2429_s0 + $0x40] sm:$0xff]  ;;  %v53_v12 = vld [vmem:[%s2429_s0 + $0x48] sm:$0xff]  ;;  %v54_v13 = vld [vmem:[%s2429_s0 + $0x50] sm:$0xff]  ;;  %s1882_s18 = smov 80   ;;  %s1884_s25 = smov 112   ;;  %vm315_vm2 = vcmask 392192  }
   0x9   :  { %1634 = vmatprep.mubr.msk.f32.mxu0 %vm60_vm0, %v46_v5  ;;  %v55_v14 = vld [vmem:[%s2429_s0 + $0x58] sm:$0xff]  ;;  %v56_v15 = vld [vmem:[%s2429_s0 + $0x60] sm:$0xff]  ;;  %v57_v16 = vld [vmem:[%s2429_s0 + $0x68] sm:$0xff]  ;;  %vm318_vm3 = vcmask 523264   ;;  %vm321_vm4 = vcmask 654336   ;;  %vm324_vm5 = vcmask 785408  }
   0xa   :  { %v58_v17 = vld [vmem:[%s2429_s0 + $0x70] sm:$0xff]  ;;  %v59_v18 = vld [vmem:[%s2429_s0 + $0x78] sm:$0xff]  ;;  %v332_v19 = vld [vmem:[%s2431_s2] sm:$0xff]  ;;  %vm327_vm6 = vcmask 916480   ;;  %s1889_s22 = smov [#allocation2]  }
   0xb   :  { %v333_v20 = vld [vmem:[%s2431_s2 + $0x8] sm:$0xff]  ;;  %v334_v21 = vld [vmem:[%s2431_s2 + $0x10] sm:$0xff]  ;;  %v335_v23 = vld [vmem:[%s2431_s2 + $0x18] sm:$0xff] }
   0xc   :  { %1635 = vmatmul.mubr.msk.f32.gmra.mrb[2].mxu0 %vm60_vm0, %v47_v6  ;;  %v1737_v22 = vpack.c.bf16 %v333_v20, %v332_v19  ;;  %v1741_v24 = vpack.c.bf16 %v335_v23, %v334_v21  ;;  %v336_v25 = vld [vmem:[%s2431_s2 + $0x20] sm:$0xff]  ;;  %v337_v26 = vld [vmem:[%s2431_s2 + $0x28] sm:$0xff]  ;;  %v338_v29 = vld [vmem:[%s2431_s2 + $0x30] sm:$0xff] }
   0xd   :  { %1637 = vmatprep.mubr.msk.f32.mxu0 %vm60_vm0, %v48_v7  ;;  %v1745_v27 = vpack.c.bf16 %v337_v26, %v336_v25  ;;  %v339_v30 = vld [vmem:[%s2431_s2 + $0x38] sm:$0xff]  ;;  %v340_v34 = vld [vmem:[%s2431_s2 + $0x40] sm:$0xff]  ;;  %v341_v35 = vld [vmem:[%s2431_s2 + $0x48] sm:$0xff] }
   0xe   :  { %1738 = vmatprep.subr.bf16.mxu1 %v1737_v22  ;;  %v1749_v32 = vpack.c.bf16 %v339_v30, %v338_v29  ;;  %v1753_v37 = vpack.c.bf16 %v341_v35, %v340_v34  ;;  %v342_v40 = vld [vmem:[%s2431_s2 + $0x50] sm:$0xff]  ;;  %v343_v41 = vld [vmem:[%s2431_s2 + $0x58] sm:$0xff]  ;;  %v344_v45 = vld [vmem:[%s2431_s2 + $0x60] sm:$0xff] }
   0xf   :  { %1740 = vmatpush3.bf16.msra.mxu1 %v1737_v22  ;;  %v1757_v43 = vpack.c.bf16 %v343_v41, %v342_v40  ;;  %v345_v46 = vld [vmem:[%s2431_s2 + $0x68] sm:$0xff]  ;;  %v346_v51 = vld [vmem:[%s2431_s2 + $0x70] sm:$0xff]  ;;  %v347_v52 = vld [vmem:[%s2431_s2 + $0x78] sm:$0xff] }
  0x10   :  { %1638 = vmatmul.mubr.msk.f32.gmra.mrb[4].mxu0 %vm60_vm0, %v49_v8  ;;  %1742 = vmatprep.subr.bf16.mxu1 %v1741_v24  ;;  %v1761_v48 = vpack.c.bf16 %v345_v46, %v344_v45  ;;  %v1765_v54 = vpack.c.bf16 %v347_v52, %v346_v51  ;;  %v330_v60 = vld [vmem:[%s2432_s3] sm:$0xff]  ;;  %v331_v61 = vld [vmem:[%s2432_s3 + $0x8] sm:$0xff]  ;;  %s1529_s3 = sshll.u32 %s1889_s22, 4  ;;  %s1530_s3 = int_to_ptr.vmem [resolvable:$true] %s1529_s3 }
  0x11   :  { %1640 = vmatprep.mubr.msk.f32.mxu0 %vm60_vm0, %v50_v9  ;;  %v2091_v62 = vpack.c.bf16 %v331_v61, %v330_v60  ;;  %v513_v7 = vld [vmem:[%s2434_s5] sm:$0xff]  ;;  %v514_v8 = vld [vmem:[%s2434_s5 + $0x8] sm:$0xff]  ;;  %v515_v9 = vld [vmem:[%s2434_s5 + $0x10] sm:$0xff]  ;;  %s1854_s23 = scalar_lea.vmem %s1530_s3, 256  ;;  %p1859_p1 = scmp.lt.s32.totalorder %s1530_s3, %s1530_s3 }
  0x12   :  { %v1558_v51 = vld [vmem:[%s2433_s4] ss:$0 sm:$0xff]  ;;  %p1855_p0 = scmp.ne.s32.totalorder %s1530_s3, %s1854_s23  ;;  %p1860_p2 = scmp.lt.s32.totalorder %s1854_s23, %s1854_s23 }
  0x13   :  { %1744 = vmatpush3.bf16.msra.mxu1 %v1741_v24 }
  0x14   :  { %1641 = vmatmul.mubr.msk.f32.gmra.mrb[6].mxu0 %vm60_vm0, %v51_v10  ;;  %1746 = vmatprep.subr.bf16.mxu1 %v1745_v27  ;;  %v1773_v10 = vpack.c.bf16 %v514_v8, %v513_v7  ;;  %p1861_p3 = por %p1860_p2, %p1859_p1 }
  0x15   :  { %1643 = vmatprep.mubr.msk.f32.mxu0 %vm60_vm0, %v52_v11  ;;  %v516_v11 = vld [vmem:[%s2434_s5 + $0x18] sm:$0xff] }
  0x16   :  { %1774 = vmatprep.subr.bf16.mxu0 %v1773_v10  ;;  %p1862_p4 = pnand %p1861_p3, %p1855_p0 }
  0x17   :  { %1748 = vmatpush3.bf16.msra.mxu1 %v1745_v27  ;;  %1776 = vmatpush3.bf16.msra.mxu0 %v1773_v10 }
  0x18   :  { %1644 = vmatmul.mubr.msk.f32.gmra.mrb[8].mxu0 %vm60_vm0, %v53_v12  ;;  %1750 = vmatprep.subr.bf16.mxu1 %v1749_v32  ;;  %v1777_v12 = vpack.c.bf16 %v516_v11, %v515_v9  ;;  %v1562_v11 = vld [vmem:[%s2437_s8] ss:$0 sm:$0xff] }
  0x19   :  { %1646 = vmatprep.mubr.msk.f32.mxu0 %vm60_vm0, %v54_v13 }
  0x1a   :  { %1778 = vmatprep.subr.bf16.mxu0 %v1777_v12 }
  0x1b   :  { %1752 = vmatpush3.bf16.msra.mxu1 %v1749_v32  ;;  %1780 = vmatpush3.bf16.msra.mxu0 %v1777_v12 }
  0x1c   :  { %1647 = vmatmul.mubr.msk.f32.gmra.mrb[10].mxu0 %vm60_vm0, %v55_v14  ;;  %1754 = vmatprep.subr.bf16.mxu1 %v1753_v37 }
  0x1d   :  { %1649 = vmatprep.mubr.msk.f32.mxu0 %vm60_vm0, %v56_v15 }
  0x1f   :  { %1756 = vmatpush3.bf16.msra.mxu1 %v1753_v37 }
  0x20   :  { %1650 = vmatmul.mubr.msk.f32.gmra.mrb[12].mxu0 %vm60_vm0, %v57_v16  ;;  %1758 = vmatprep.subr.bf16.mxu1 %v1757_v43 }
  0x21   :  { %1652 = vmatprep.mubr.msk.f32.mxu0 %vm60_vm0, %v58_v17 }
  0x23   :  { %1760 = vmatpush3.bf16.msra.mxu1 %v1757_v43 }
  0x24   :  { %1653 = vmatmul.mubr.msk.f32.gmra.mrb[14].mxu0 %vm60_vm0, %v59_v18  ;;  %1762 = vmatprep.subr.bf16.mxu1 %v1761_v48 }
  0x27   :  { %1764 = vmatpush3.bf16.msra.mxu1 %v1761_v48  ;;  %v605_v48 = vld [vmem:[%s2436_s7] sm:$0xff] }
  0x28   :  { %1766 = vmatprep.subr.bf16.mxu1 %v1765_v54 }
  0x2b   :  { %1768 = vmatpush3.bf16.msra.mxu1 %v1765_v54 }
  0x2c   :  { %1770 = vmatprep.subr.bf16.mxu1 %v2091_v62 }
  0xdb   :  { %v2051_v28 = vpop.f32.mrb[0].mxu0 }
  0xdc   :  { %v2059_v31 = vpop.f32.mrb[1].mxu0 }
  0xdf   :  { %v1636_v33 = vpop.f32.mrb[2].mxu0 }
  0xe0   :  { %v185_v36 = vpop.f32.mrb[3].mxu0 }
  0xe1   :  { %v1811_v38 = vpack.i.bf16 %v1636_v33, %v185_v36 }
  0xe3   :  { %1812 = vrot.lane.b32.xlu0 %v1811_v38, %s1878_s19  ;;  %v1639_v39 = vpop.f32.mrb[4].mxu0  ;;  %s1883_s19 = smov 96  }
  0xe4   :  { %v195_v42 = vpop.f32.mrb[5].mxu0 }
  0xe5   :  { %v1816_v44 = vpack.i.bf16 %v1639_v39, %v195_v42 }
  0xe7   :  { %1817 = vrot.lane.b32.xlu0 %v1816_v44, %s1879_s27  ;;  %v1642_v47 = vpop.f32.mrb[6].mxu0 }
  0xe8   :  { %v205_v49 = vpop.f32.mrb[7].mxu0 }
  0xe9   :  { %v1821_v50 = vpack.i.bf16 %v1642_v47, %v205_v49  ;;  %v606_v49 = vld [vmem:[%s2436_s7 + $0x8] sm:$0xff] }
  0xeb   :  { %1822 = vrot.lane.b32.xlu1 %v1821_v50, %s1880_s13  ;;  %v1645_v53 = vpop.f32.mrb[8].mxu0  ;;  %v1781_v50 = vpack.c.bf16 %v606_v49, %v605_v48 }
  0xec   :  { %v215_v55 = vpop.f32.mrb[9].mxu0 }
  0xed   :  { %v1826_v56 = vpack.i.bf16 %v1645_v53, %v215_v55  ;;  %1782 = vmatprep.subr.bf16.mxu0 %v1781_v50 }
  0xef   :  { %1827 = vrot.lane.b32.xlu1 %v1826_v56, %s1881_s14  ;;  %v1648_v57 = vpop.f32.mrb[10].mxu0 }
  0xf0   :  { %v225_v58 = vpop.f32.mrb[11].mxu0 }
  0xf1   :  { %v1831_v59 = vpack.i.bf16 %v1648_v57, %v225_v58  ;;  %v1885_v57 = vmov 0.0|0.0   ;;  %v700_v58 = vlaneseq }
  0xf3   :  { %1832 = vrot.lane.b32.xlu0 %v1831_v59, %s1882_s18  ;;  %v1651_v63 = vpop.f32.mrb[12].mxu0  ;;  %v701_v59 = vshrl.u32 %v700_v58, 7  ;;  %v937_v60 = vand.u32 127, %v700_v58 }
  0xf4   :  { %v235_v2 = vpop.f32.mrb[13].mxu0 }
  0xf5   :  { %v1836_v3 = vpack.i.bf16 %v1651_v63, %v235_v2  ;;  %v2142_v61 = vsub.s32 %v937_v60, %v701_v59  ;;  %v1559_v2 = vld [vmem:[%s2435_s6] ss:$0 sm:$0xff] }
  0xf7   :  { %1837 = vrot.lane.b32.xlu1 %v1836_v3, %s1883_s19  ;;  %v1654_v4 = vpop.f32.mrb[14].mxu0  ;;  %v1886_v3 = vmov 1966171168  }
  0xf8   :  { %v245_v5 = vpop.f32.mrb[15].mxu0 }
  0xf9   :  { %v1841_v6 = vpack.i.bf16 %v1654_v4, %v245_v5  ;;  %v698_v4 = vunpack.c.l.s4 %v1886_v3 }
  0xfb   :  { %1842 = vrot.lane.b32.xlu0 %v1841_v6, %s1884_s25  ;;  %v699_v9 = vunpack.c.0.s8 %v698_v4 }
  0xfd   :  { %v2161_v12 = vsub.s32 %v699_v9, %v701_v59 }
 0x155   :  { %v1813_v13 = vpop.permute.xlu0 %1812 }
 0x156   :  { %v1815_v17 = vunpack.i.h.bf16 %v1813_v13  ;;  %v1814_v18 = vunpack.i.l.bf16 %v1813_v13 }
 0x158   :  { %v311_v27 = vsel %vm60_vm0, %v2051_v28, %v1815_v17  ;;  %v310_v29 = vsel %vm60_vm0, %v2059_v31, %v1814_v18 }
 0x159   :  { %v1818_v15 = vpop.permute.xlu0 %1817 }
 0x15a   :  { %v1820_v19 = vunpack.i.h.bf16 %v1818_v15  ;;  %v1819_v20 = vunpack.i.l.bf16 %v1818_v15 }
 0x15c   :  { %v314_v33 = vsel %vm312_vm1, %v311_v27, %v1820_v19  ;;  %v313_v34 = vsel %vm312_vm1, %v310_v29, %v1819_v20 }
 0x15d   :  { %v1823_v14 = vpop.permute.xlu1 %1822 }
 0x15e   :  { %v1825_v22 = vunpack.i.h.bf16 %v1823_v14  ;;  %v1824_v23 = vunpack.i.l.bf16 %v1823_v14 }
 0x160   :  { %v317_v37 = vsel %vm315_vm2, %v314_v33, %v1825_v22  ;;  %v316_v38 = vsel %vm315_vm2, %v313_v34, %v1824_v23 }
 0x161   :  { %v1828_v16 = vpop.permute.xlu1 %1827 }
 0x162   :  { %v1830_v24 = vunpack.i.h.bf16 %v1828_v16  ;;  %v1829_v25 = vunpack.i.l.bf16 %v1828_v16 }
 0x164   :  { %v320_v39 = vsel %vm318_vm3, %v317_v37, %v1830_v24  ;;  %v319_v28 = vsel %vm318_vm3, %v316_v38, %v1829_v25 }
 0x165   :  { %v1833_v21 = vpop.permute.xlu0 %1832 }
 0x166   :  { %v1835_v30 = vunpack.i.h.bf16 %v1833_v21  ;;  %v1834_v32 = vunpack.i.l.bf16 %v1833_v21  ;;  %v2165_v21 = vsub.s32 0, %v701_v59 }
 0x168   :  { %v322_v42 = vsel %vm321_vm4, %v319_v28, %v1834_v32  ;;  %v323_v43 = vsel %vm321_vm4, %v320_v39, %v1835_v30 }
 0x169   :  { %v1838_v26 = vpop.permute.xlu1 %1837 }
 0x16a   :  { %v1840_v35 = vunpack.i.h.bf16 %v1838_v26  ;;  %v1839_v36 = vunpack.i.l.bf16 %v1838_v26 }
 0x16c   :  { %v325_v44 = vsel %vm324_vm5, %v322_v42, %v1839_v36  ;;  %v326_v45 = vsel %vm324_vm5, %v323_v43, %v1840_v35 }
 0x16d   :  { %v1843_v40 = vpop.permute.xlu0 %1842 }
 0x16e   :  { %v1845_v31 = vunpack.i.h.bf16 %v1843_v40  ;;  %v1844_v41 = vunpack.i.l.bf16 %v1843_v40 }
 0x170   :  { %v328_v46 = vsel %vm327_vm6, %v325_v44, %v1844_v41  ;;  %v329_v47 = vsel %vm327_vm6, %v326_v45, %v1845_v31  ;;  %v2207_v45 = vld [vmem:[%s2438_s9] ss:$0 sm:$0xff] }
 0x171   :  { %1687 = vmatprep.mubr.f32.mxu1 %v328_v46 }
 0x172   :  { %1688 = vmatmul.mubr.f32.vlgmr.msra.gmra.mrb[0].mxu1 %v329_v47 }
 0x173   :  { %1772 = vmatpush3.bf16.msra.mxu1 %v2091_v62  ;;  %1694 = vmatprep.mubr.msk.f32.mxu1 %vm60_vm0, %v1960_v0  ;;  %v607_v0 = vld [vmem:[%s2436_s7 + $0x10] sm:$0xff]  ;;  %v942_v62 = vadd.s32 4294967288, %v937_v60 }
 0x174   :  { %1789 = vmatprep.subr.bf16.mxu1 %v1885_v57 }
 0x175   :  { %v2144_v63 = vsub.s32 %v942_v62, %v701_v59 }
 0x17a   :  { %1695 = vmatmul.mubr.msk.f32.vlgmr.msra.gmra.mrb[0].mxu1 %vm60_vm0, %v1965_v1  ;;  %v608_v1 = vld [vmem:[%s2436_s7 + $0x18] sm:$0xff] }
 0x17b   :  { %v1785_v56 = vpack.c.bf16 %v608_v1, %v607_v0 }
 0x24d   :  { %v1696_v52 = vpop.f32.mrb[0].mxu1 }
 0x24e   :  { %v495_v53 = vpop.f32.mrb[1].mxu1  ;;  %v512_v55 = vadd.f32 %v1696_v52, %v1558_v51 }
 0x24f   :  { %v511_v54 = vadd.f32 %v1558_v51, %v495_v53 }
 0x251   :  { %1705 = vmatprep.mubr.msk.f32.mxu0 %vm312_vm1, %v511_v54 }
 0x252   :  { %1706 = vmatmul.mubr.msk.f32.vlgmr.msra.gmra.mrb[16].mxu0 %vm312_vm1, %v512_v55 }
 0x253   :  { %1784 = vmatpush3.bf16.msra.mxu0 %v1781_v50  ;;  %1716 = vmatprep.mubr.msk.f32.mxu0 %vm312_vm1, %v511_v54 }
 0x254   :  { %1786 = vmatprep.subr.bf16.mxu0 %v1785_v56 }
 0x257   :  { %1788 = vmatpush3.bf16.msra.mxu0 %v1785_v56 }
 0x25a   :  { %1717 = vmatmul.mubr.msk.f32.vlgmr.msra.gmra.mrb[18].mxu0 %vm312_vm1, %v512_v55 }
 0x325   :  { %v1707_v5 = vpop.f32.mrb[16].mxu0 }
 0x326   :  { %v2149_v6 = vadd.f32 %v1707_v5, %v1559_v2  ;;  %v596_v7 = vpop.f32.mrb[17].mxu0 }
 0x327   :  { %v2151_v8 = vadd.f32 %v1559_v2, %v596_v7 }
 0x329   :  { %v2155_v10 = vpack.c.bf16 %v2149_v6, %v2151_v8 }
 0x32b   :  { %1791 = vmatpush3.bf16.msra.mxu1 %v2155_v10 }
 0x32c   :  { %1792 = vmatprep.subr.bf16.mxu1 %v1885_v57 }
 0x32d   :  { %v1718_v13 = vpop.f32.mrb[18].mxu0 }
 0x32e   :  { %v688_v14 = vadd.f32 %v1718_v13, %v1562_v11  ;;  %v682_v15 = vpop.f32.mrb[19].mxu0 }
 0x32f   :  { %v683_v16 = vadd.f32 %v1562_v11, %v682_v15 }
 0x330   :  { %v1122_v17 = vcombine.high %v688_v14, %v688_v14  ;;  %v1129_v18 = vrot.slane %v688_v14, %v2161_v12 }
 0x331   :  { %v696_v19 = vcombine.high %v683_v16, %v683_v16  ;;  %v703_v20 = vrot.slane %v683_v16, %v2161_v12 }
 0x332   :  { %v2168_v22 = vrot.slane %v1122_v17, %v2161_v12  ;;  %v1137_v23 = vcombine.high %v1129_v18, %v1129_v18  ;;  %v1145_v24 = vrot.slane %v1129_v18, %v2161_v12 }
 0x333   :  { %v2175_v27 = vrot.slane %v696_v19, %v2161_v12  ;;  %v719_v29 = vrot.slane %v703_v20, %v2161_v12  ;;  %v711_v32 = vcombine.high %v703_v20, %v703_v20 }
 0x334   :  { %v2172_v25 = vrot.slane %v1137_v23, %v2161_v12  ;;  %v1167_v26 = vcombine.high %v1145_v24, %v1145_v24  ;;  %v2180_v30 = vrot.slane %v2168_v22, %v2161_v12  ;;  %v1174_v33 = vrot.slane %v1145_v24, %v2165_v21 }
 0x335   :  { %v1138_v36 = vcombine.high %v2168_v22, %v2168_v22  ;;  %v712_v37 = vcombine.high %v2175_v27, %v2175_v27  ;;  %v748_v38 = vrot.slane %v719_v29, %v2165_v21  ;;  %v2195_v28 = vrot.slane %v2175_v27, %v2161_v12 }
 0x336   :  { %v1178_v34 = vrot.slane %v2172_v25, %v2165_v21  ;;  %v1182_v35 = vrot.slane %v1167_v26, %v2165_v21  ;;  %v1190_v39 = vrot.slane %v2180_v30, %v2165_v21  ;;  %v2198_v40 = vrot.slane %v711_v32, %v2161_v12 }
 0x337   :  { %v741_v31 = vcombine.high %v719_v29, %v719_v29  ;;  %v1212_v41 = vadd.f32 %v1174_v33, %v2149_v6  ;;  %v1211_v42 = vadd.f32 %v1174_v33, %v2151_v8  ;;  %v786_v43 = vadd.f32 %v748_v38, %v2149_v6 }
 0x338   :  { %v785_v44 = vadd.f32 %v748_v38, %v2151_v8  ;;  %v1213_v46 = vadd.f32 %v1178_v34, %v2151_v8  ;;  %v1214_v47 = vadd.f32 %v1178_v34, %v2149_v6  ;;  %v1215_v48 = vadd.f32 %v1182_v35, %v2151_v8 }
 0x339   :  { %v1216_v49 = vadd.f32 %v1182_v35, %v2149_v6  ;;  %vm1228_vm7 = vcmp.ge.f32.partialorder %v1212_v41, 0.0  ;;  %v1244_v50 = vmul.f32 0.2, %v1212_v41  ;;  %vm1227_vm8 = vcmp.ge.f32.partialorder %v1211_v42, 0.0 }
 0x33a   :  { %v1243_v51 = vmul.f32 0.2, %v1211_v42  ;;  %vm802_vm9 = vcmp.ge.f32.partialorder %v786_v43, 0.0  ;;  %v818_v52 = vmul.f32 0.2, %v786_v43  ;;  %vm801_vm10 = vcmp.ge.f32.partialorder %v785_v44, 0.0 }
 0x33b   :  { %v817_v0 = vmul.f32 0.2, %v785_v44  ;;  %v1260_v1 = vsel %vm1228_vm7, %v1212_v41, %v1244_v50  ;;  %vm1229_vm11 = vcmp.ge.f32.partialorder %v1213_v46, 0.0  ;;  %v1245_v54 = vmul.f32 0.2, %v1213_v46 }
 0x33c   :  { %v1259_v53 = vsel %vm1227_vm8, %v1211_v42, %v1243_v51  ;;  %v1276_v55 = vmul.f32 %v2207_v45, %v1260_v1  ;;  %v834_v57 = vsel %vm802_vm9, %v786_v43, %v818_v52  ;;  %v752_v59 = vrot.slane %v2198_v40, %v2165_v21 }
 0x33d   :  { %v1275_v56 = vmul.f32 %v2207_v45, %v1259_v53  ;;  %v833_v58 = vsel %vm801_vm10, %v785_v44, %v817_v0  ;;  %v856_v60 = vmul.f32 %v2207_v45, %v834_v57  ;;  %v1261_v62 = vsel %vm1229_vm11, %v1213_v46, %v1245_v54 }
 0x33e   :  { %vm1230_vm12 = vcmp.ge.f32.partialorder %v1214_v47, 0.0  ;;  %v1294_v2 = vsel %vm312_vm1, %v1276_v55, 0.0  ;;  %v855_v4 = vmul.f32 %v2207_v45, %v833_v58  ;;  %v1246_v5 = vmul.f32 0.2, %v1214_v47 }
 0x33f   :  { %v1291_v3 = vsel %vm312_vm1, %v1275_v56, 0.0  ;;  %v756_v7 = vrot.slane %v741_v31, %v2165_v21  ;;  %1295 = vadd.xlane.f32.xlu1 %v1294_v2  ;;  %v1277_v9 = vmul.f32 %v2207_v45, %v1261_v62  ;;  %vm1231_vm13 = vcmp.ge.f32.partialorder %v1215_v48, 0.0 }
 0x340   :  { %1292 = vadd.xlane.f32.xlu0 %v1291_v3  ;;  %v1247_v11 = vmul.f32 0.2, %v1215_v48  ;;  %v874_v13 = vsel %vm312_vm1, %v856_v60, 0.0  ;;  %v1262_v14 = vsel %vm1230_vm12, %v1214_v47, %v1246_v5  ;;  %vm1232_vm14 = vcmp.ge.f32.partialorder %v1216_v49, 0.0 }
 0x341   :  { %v1248_v15 = vmul.f32 0.2, %v1216_v49  ;;  %v1278_v16 = vmul.f32 %v2207_v45, %v1262_v14  ;;  %v1219_v18 = vadd.f32 %v1190_v39, %v2151_v8  ;;  %v1220_v19 = vadd.f32 %v1190_v39, %v2149_v6 }
 0x342   :  { %v1263_v17 = vsel %vm1231_vm13, %v1215_v48, %v1247_v11  ;;  %v871_v20 = vsel %vm312_vm1, %v855_v4, 0.0  ;;  %v787_v24 = vadd.f32 %v752_v59, %v2151_v8  ;;  %v788_v26 = vadd.f32 %v752_v59, %v2149_v6 }
 0x343   :  { %v1264_v23 = vsel %vm1232_vm14, %v1216_v49, %v1248_v15  ;;  %v764_v29 = vrot.slane %v2195_v28, %v2165_v21  ;;  %872 = vadd.xlane.f32.xlu1 %v871_v20  ;;  %v1297_v32 = vsel %vm312_vm1, %v1277_v9, 0.0  ;;  %vm1235_vm15 = vcmp.ge.f32.partialorder %v1219_v18, 0.0 }
 0x344   :  { %875 = vadd.xlane.f32.xlu0 %v874_v13  ;;  %v1251_v33 = vmul.f32 0.2, %v1219_v18  ;;  %v1279_v34 = vmul.f32 %v2207_v45, %v1263_v17  ;;  %v1280_v35 = vmul.f32 %v2207_v45, %v1264_v23  ;;  %vm1236_vm2 = vcmp.ge.f32.partialorder %v1220_v19, 0.0 }
 0x345   :  { %v1252_v38 = vmul.f32 0.2, %v1220_v19  ;;  %v1300_v39 = vsel %vm312_vm1, %v1278_v16, 0.0  ;;  %vm803_vm3 = vcmp.ge.f32.partialorder %v787_v24, 0.0  ;;  %v819_v41 = vmul.f32 0.2, %v787_v24 }
 0x346   :  { %v1267_v31 = vsel %vm1235_vm15, %v1219_v18, %v1251_v33  ;;  %vm804_vm4 = vcmp.ge.f32.partialorder %v788_v26, 0.0  ;;  %v820_v43 = vmul.f32 0.2, %v788_v26  ;;  %v789_v44 = vadd.f32 %v756_v7, %v2151_v8 }
 0x347   :  { %v1268_v42 = vsel %vm1236_vm2, %v1220_v19, %v1252_v38  ;;  %v2241_v46 = vrot.slane %v1138_v36, %v2161_v12  ;;  %v1169_v47 = vcombine.high %v2172_v25, %v2172_v25  ;;  %1301 = vadd.xlane.f32.xlu1 %v1300_v39  ;;  %v790_v48 = vadd.f32 %v756_v7, %v2149_v6 }
 0x348   :  { %1298 = vadd.xlane.f32.xlu0 %v1297_v32  ;;  %v1303_v49 = vsel %vm312_vm1, %v1279_v34, 0.0  ;;  %v1306_v50 = vsel %vm312_vm1, %v1280_v35, 0.0  ;;  %v1283_v51 = vmul.f32 %v2207_v45, %v1267_v31  ;;  %v1284_v52 = vmul.f32 %v2207_v45, %v1268_v42 }
 0x349   :  { %v835_v0 = vsel %vm803_vm3, %v787_v24, %v819_v41  ;;  %v836_v1 = vsel %vm804_vm4, %v788_v26, %v820_v43  ;;  %vm805_vm5 = vcmp.ge.f32.partialorder %v789_v44, 0.0  ;;  %v821_v22 = vmul.f32 0.2, %v789_v44 }
 0x34a   :  { %vm806_vm6 = vcmp.ge.f32.partialorder %v790_v48, 0.0  ;;  %v822_v36 = vmul.f32 0.2, %v790_v48  ;;  %v793_v25 = vadd.f32 %v764_v29, %v2151_v8  ;;  %v794_v53 = vadd.f32 %v764_v29, %v2149_v6 }
 0x34b   :  { %v1168_v54 = vcombine.high %v2180_v30, %v2180_v30  ;;  %1307 = vadd.xlane.f32.xlu1 %v1306_v50  ;;  %v1186_v55 = vrot.slane %v1169_v47, %v2165_v21  ;;  %v1194_v56 = vrot.slane %v2241_v46, %v2165_v21  ;;  %v1315_v57 = vsel %vm312_vm1, %v1283_v51, 0.0 }
 0x34c   :  { %1304 = vadd.xlane.f32.xlu0 %v1303_v49  ;;  %v1318_v58 = vsel %vm312_vm1, %v1284_v52, 0.0  ;;  %v857_v59 = vmul.f32 %v2207_v45, %v835_v0  ;;  %v837_v60 = vsel %vm805_vm5, %v789_v44, %v821_v22  ;;  %v858_v62 = vmul.f32 %v2207_v45, %v836_v1 }
 0x34d   :  { %v838_v2 = vsel %vm806_vm6, %v790_v48, %v822_v36  ;;  %v825_v3 = vmul.f32 0.2, %v793_v25  ;;  %v1217_v30 = vadd.f32 %v1186_v55, %v2151_v8  ;;  %vm809_vm7 = vcmp.ge.f32.partialorder %v793_v25, 0.0 }
 0x34e   :  { %v826_v4 = vmul.f32 0.2, %v794_v53  ;;  %v1218_v5 = vadd.f32 %v1186_v55, %v2149_v6  ;;  %v1221_v7 = vadd.f32 %v1194_v56, %v2151_v8  ;;  %v859_v9 = vmul.f32 %v2207_v45, %v837_v60 }
 0x34f   :  { %1319 = vadd.xlane.f32.xlu1 %v1318_v58  ;;  %vm810_vm8 = vcmp.ge.f32.partialorder %v794_v53, 0.0  ;;  %v740_v11 = vrot.slane %v712_v37, %v2161_v12  ;;  %v743_v13 = vcombine.high %v2198_v40, %v2198_v40  ;;  %v860_v14 = vmul.f32 %v2207_v45, %v838_v2 }
 0x350   :  { %1316 = vadd.xlane.f32.xlu0 %v1315_v57  ;;  %v877_v15 = vsel %vm312_vm1, %v857_v59, 0.0  ;;  %v880_v16 = vsel %vm312_vm1, %v858_v62, 0.0  ;;  %v841_v17 = vsel %vm809_vm7, %v793_v25, %v825_v3  ;;  %v1222_v18 = vadd.f32 %v1194_v56, %v2149_v6 }
 0x351   :  { %v842_v19 = vsel %vm810_vm8, %v794_v53, %v826_v4  ;;  %v1249_v20 = vmul.f32 0.2, %v1217_v30  ;;  %v1250_v23 = vmul.f32 0.2, %v1218_v5  ;;  %v1198_v24 = vrot.slane %v1168_v54, %v2165_v21 }
 0x352   :  { %v883_v12 = vsel %vm312_vm1, %v859_v9, 0.0  ;;  %vm1233_vm9 = vcmp.ge.f32.partialorder %v1217_v30, 0.0  ;;  %vm1234_vm10 = vcmp.ge.f32.partialorder %v1218_v5, 0.0  ;;  %v886_v27 = vsel %vm312_vm1, %v860_v14, 0.0 }
 0x353   :  { %881 = vadd.xlane.f32.xlu1 %v880_v16  ;;  %v863_v37 = vmul.f32 %v2207_v45, %v841_v17  ;;  %v1223_v40 = vadd.f32 %v1198_v24, %v2151_v8  ;;  %v1224_v26 = vadd.f32 %v1198_v24, %v2149_v6  ;;  %v864_v29 = vmul.f32 %v2207_v45, %v842_v19 }
 0x354   :  { %878 = vadd.xlane.f32.xlu0 %v877_v15  ;;  %v1253_v32 = vmul.f32 0.2, %v1221_v7  ;;  %v760_v33 = vrot.slane %v743_v13, %v2165_v21  ;;  %v768_v34 = vrot.slane %v740_v11, %v2165_v21  ;;  %v1265_v35 = vsel %vm1233_vm9, %v1217_v30, %v1249_v20 }
 0x355   :  { %v1266_v38 = vsel %vm1234_vm10, %v1218_v5, %v1250_v23  ;;  %vm1237_vm11 = vcmp.ge.f32.partialorder %v1221_v7, 0.0  ;;  %v1254_v39 = vmul.f32 0.2, %v1222_v18  ;;  %v1170_v31 = vcombine.high %v2241_v46, %v2241_v46 }
 0x356   :  { %v742_v41 = vcombine.high %v2195_v28, %v2195_v28  ;;  %vm1238_vm12 = vcmp.ge.f32.partialorder %v1222_v18, 0.0  ;;  %v791_v42 = vadd.f32 %v760_v33, %v2151_v8  ;;  %v744_v43 = vcombine.high %v740_v11, %v740_v11 }
 0x357   :  { %887 = vadd.xlane.f32.xlu1 %v886_v27  ;;  %v792_v44 = vadd.f32 %v760_v33, %v2149_v6  ;;  %v795_v47 = vadd.f32 %v768_v34, %v2151_v8  ;;  %v796_v48 = vadd.f32 %v768_v34, %v2149_v6  ;;  %v895_v49 = vsel %vm312_vm1, %v863_v37, 0.0 }
 0x358   :  { %884 = vadd.xlane.f32.xlu0 %v883_v12  ;;  %v1281_v50 = vmul.f32 %v2207_v45, %v1265_v35  ;;  %v1282_v46 = vmul.f32 %v2207_v45, %v1266_v38  ;;  %v1269_v51 = vsel %vm1237_vm11, %v1221_v7, %v1253_v32  ;;  %v898_v28 = vsel %vm312_vm1, %v864_v29, 0.0 }
 0x359   :  { %v1270_v52 = vsel %vm1238_vm12, %v1222_v18, %v1254_v39  ;;  %v1255_v0 = vmul.f32 0.2, %v1223_v40  ;;  %v1256_v1 = vmul.f32 0.2, %v1224_v26  ;;  %vm1239_vm13 = vcmp.ge.f32.partialorder %v1223_v40, 0.0 }
 0x35a   :  { %vm1240_vm14 = vcmp.ge.f32.partialorder %v1224_v26, 0.0  ;;  %v1285_v22 = vmul.f32 %v2207_v45, %v1269_v51  ;;  %v1309_v36 = vsel %vm312_vm1, %v1281_v50, 0.0  ;;  %v1312_v25 = vsel %vm312_vm1, %v1282_v46, 0.0 }
 0x35b   :  { %899 = vadd.xlane.f32.xlu1 %v898_v28  ;;  %v1286_v53 = vmul.f32 %v2207_v45, %v1270_v52  ;;  %v772_v54 = vrot.slane %v742_v41, %v2165_v21  ;;  %v1271_v55 = vsel %vm1239_vm13, %v1223_v40, %v1255_v0  ;;  %v1272_v56 = vsel %vm1240_vm14, %v1224_v26, %v1256_v1 }
 0x35c   :  { %896 = vadd.xlane.f32.xlu0 %v895_v49  ;;  %v776_v57 = vrot.slane %v744_v43, %v2165_v21  ;;  %v1202_v58 = vrot.slane %v1170_v31, %v2165_v21  ;;  %vm807_vm15 = vcmp.ge.f32.partialorder %v791_v42, 0.0  ;;  %v823_v59 = vmul.f32 0.2, %v791_v42 }
 0x35d   :  { %v824_v60 = vmul.f32 0.2, %v792_v44  ;;  %v797_v62 = vadd.f32 %v772_v54, %v2151_v8  ;;  %vm808_vm2 = vcmp.ge.f32.partialorder %v792_v44, 0.0  ;;  %v798_v2 = vadd.f32 %v772_v54, %v2149_v6 }
 0x35e   :  { %v799_v3 = vadd.f32 %v776_v57, %v2151_v8  ;;  %v800_v30 = vadd.f32 %v776_v57, %v2149_v6  ;;  %v1225_v4 = vadd.f32 %v1202_v58, %v2151_v8  ;;  %v1321_v5 = vsel %vm312_vm1, %v1285_v22, 0.0 }
 0x35f   :  { %1313 = vadd.xlane.f32.xlu1 %v1312_v25  ;;  %v1324_v21 = vsel %vm312_vm1, %v1286_v53, 0.0  ;;  %v1287_v7 = vmul.f32 %v2207_v45, %v1271_v55  ;;  %v1288_v9 = vmul.f32 %v2207_v45, %v1272_v56  ;;  %v839_v11 = vsel %vm807_vm15, %v791_v42, %v823_v59 }
 0x360   :  { %1310 = vadd.xlane.f32.xlu0 %v1309_v36  ;;  %v840_v13 = vsel %vm808_vm2, %v792_v44, %v824_v60  ;;  %v827_v14 = vmul.f32 0.2, %v795_v47  ;;  %v828_v15 = vmul.f32 0.2, %v796_v48  ;;  %vm811_vm3 = vcmp.ge.f32.partialorder %v795_v47, 0.0 }
 0x361   :  { %vm812_vm4 = vcmp.ge.f32.partialorder %v796_v48, 0.0  ;;  %v1226_v16 = vadd.f32 %v1202_v58, %v2149_v6  ;;  %v1327_v8 = vsel %vm312_vm1, %v1287_v7, 0.0  ;;  %v1330_v17 = vsel %vm312_vm1, %v1288_v9, 0.0 }
 0x362   :  { %v861_v18 = vmul.f32 %v2207_v45, %v839_v11  ;;  %v862_v19 = vmul.f32 %v2207_v45, %v840_v13  ;;  %v843_v20 = vsel %vm811_vm3, %v795_v47, %v827_v14  ;;  %v844_v23 = vsel %vm812_vm4, %v796_v48, %v828_v15 }
 0x363   :  { %1325 = vadd.xlane.f32.xlu1 %v1324_v21  ;;  %v829_v24 = vmul.f32 0.2, %v797_v62  ;;  %v830_v12 = vmul.f32 0.2, %v798_v2  ;;  %vm813_vm5 = vcmp.ge.f32.partialorder %v797_v62, 0.0  ;;  %vm814_vm6 = vcmp.ge.f32.partialorder %v798_v2, 0.0 }
 0x364   :  { %1322 = vadd.xlane.f32.xlu0 %v1321_v5  ;;  %v889_v27 = vsel %vm312_vm1, %v861_v18, 0.0  ;;  %v892_v6 = vsel %vm312_vm1, %v862_v19, 0.0  ;;  %v865_v37 = vmul.f32 %v2207_v45, %v843_v20  ;;  %v866_v40 = vmul.f32 %v2207_v45, %v844_v23 }
 0x365   :  { %v845_v26 = vsel %vm813_vm5, %v797_v62, %v829_v24  ;;  %v846_v29 = vsel %vm814_vm6, %v798_v2, %v830_v12  ;;  %v831_v32 = vmul.f32 0.2, %v799_v3  ;;  %v832_v33 = vmul.f32 0.2, %v800_v30 }
 0x366   :  { %vm815_vm7 = vcmp.ge.f32.partialorder %v799_v3, 0.0  ;;  %vm816_vm8 = vcmp.ge.f32.partialorder %v800_v30, 0.0  ;;  %v901_v34 = vsel %vm312_vm1, %v865_v37, 0.0  ;;  %v904_v35 = vsel %vm312_vm1, %v866_v40, 0.0 }
 0x367   :  { %1331 = vadd.xlane.f32.xlu1 %v1330_v17  ;;  %v867_v38 = vmul.f32 %v2207_v45, %v845_v26  ;;  %v868_v39 = vmul.f32 %v2207_v45, %v846_v29  ;;  %v847_v31 = vsel %vm815_vm7, %v799_v3, %v831_v32  ;;  %v848_v41 = vsel %vm816_vm8, %v800_v30, %v832_v33 }
 0x368   :  { %1328 = vadd.xlane.f32.xlu0 %v1327_v8  ;;  %v1257_v42 = vmul.f32 0.2, %v1225_v4  ;;  %v1258_v43 = vmul.f32 0.2, %v1226_v16  ;;  %vm1241_vm9 = vcmp.ge.f32.partialorder %v1225_v4, 0.0  ;;  %vm1242_vm10 = vcmp.ge.f32.partialorder %v1226_v16, 0.0 }
 0x369   :  { %v907_v44 = vsel %vm312_vm1, %v867_v38, 0.0  ;;  %v910_v47 = vsel %vm312_vm1, %v868_v39, 0.0  ;;  %v869_v48 = vmul.f32 %v2207_v45, %v847_v31  ;;  %v870_v49 = vmul.f32 %v2207_v45, %v848_v41 }
 0x36a   :  { %v1273_v50 = vsel %vm1241_vm9, %v1225_v4, %v1257_v42  ;;  %v1274_v46 = vsel %vm1242_vm10, %v1226_v16, %v1258_v43  ;;  %vm947_vm11 = vcmask 130112   ;;  %vm1012_vm12 = vcmask 1041409  }
 0x36b   :  { %893 = vadd.xlane.f32.xlu1 %v892_v6  ;;  %v913_v51 = vsel %vm312_vm1, %v869_v48, 0.0  ;;  %v916_v28 = vsel %vm312_vm1, %v870_v49, 0.0  ;;  %v1289_v52 = vmul.f32 %v2207_v45, %v1273_v50  ;;  %v1290_v0 = vmul.f32 %v2207_v45, %v1274_v46 }
 0x36c   :  { %890 = vadd.xlane.f32.xlu0 %v889_v27  ;;  %vm1014_vm13 = vcmask 1042434   ;;  %vm1016_vm14 = vcmask 1043459   ;;  %vm1018_vm15 = vcmask 1044484   ;;  %vm1020_vm2 = vcmask 1045509  }
 0x36d   :  { %v1333_v1 = vsel %vm312_vm1, %v1289_v52, 0.0  ;;  %v1336_v22 = vsel %vm312_vm1, %v1290_v0, 0.0  ;;  %vm1022_vm3 = vcmask 1046534   ;;  %vm1024_vm4 = vcmask 1047559  }
 0x36e   :  { %vm1887_vm7 = vmmov 0  }
 0x36f   :  { %905 = vadd.xlane.f32.xlu1 %v904_v35 }
 0x370   :  { %902 = vadd.xlane.f32.xlu0 %v901_v34 }
 0x373   :  { %911 = vadd.xlane.f32.xlu1 %v910_v47 }
 0x374   :  { %908 = vadd.xlane.f32.xlu0 %v907_v44 }
 0x377   :  { %917 = vadd.xlane.f32.xlu1 %v916_v28 }
 0x378   :  { %914 = vadd.xlane.f32.xlu0 %v913_v51 }
 0x37b   :  { %1337 = vadd.xlane.f32.xlu1 %v1336_v22 }
 0x37c   :  { %1334 = vadd.xlane.f32.xlu0 %v1333_v1 }
 0x3cc   :  { %v1296_v36 = vpop.xlane.xlu1 %1295 }
 0x3cd   :  { %v1293_v25 = vpop.xlane.xlu0 %1292  ;;  %v1363_v53 = vrot.slane %v1296_v36, %v2144_v63 }
 0x3ce   :  { %v1359_v54 = vrot.slane %v1293_v25, %v2142_v61 }
 0x3d0   :  { %v1364_v55 = vsel %vm947_vm11, %v1363_v53, %v1359_v54  ;;  %v873_v57 = vpop.xlane.xlu1 %872 }
 0x3d1   :  { %v876_v56 = vpop.xlane.xlu0 %875  ;;  %v941_v58 = vrot.slane %v873_v57, %v2142_v61 }
 0x3d2   :  { %v946_v45 = vrot.slane %v876_v56, %v2144_v63 }
 0x3d4   :  { %v948_v59 = vsel %vm947_vm11, %v946_v45, %v941_v58  ;;  %v1302_v62 = vpop.xlane.xlu1 %1301 }
 0x3d5   :  { %v1299_v60 = vpop.xlane.xlu0 %1298  ;;  %v1372_v3 = vrot.slane %v1302_v62, %v2144_v63 }
 0x3d6   :  { %v1368_v2 = vrot.slane %v1299_v60, %v2142_v61 }
 0x3d8   :  { %v1373_v30 = vsel %vm947_vm11, %v1372_v3, %v1368_v2  ;;  %v1308_v21 = vpop.xlane.xlu1 %1307 }
 0x3d9   :  { %v1428_v4 = vsel %vm1012_vm12, %v1373_v30, %v1364_v55  ;;  %v1305_v5 = vpop.xlane.xlu0 %1304  ;;  %v1381_v9 = vrot.slane %v1308_v21, %v2144_v63 }
 0x3da   :  { %v1377_v7 = vrot.slane %v1305_v5, %v2142_v61 }
 0x3dc   :  { %v1382_v11 = vsel %vm947_vm11, %v1381_v9, %v1377_v7  ;;  %v1320_v15 = vpop.xlane.xlu1 %1319 }
 0x3dd   :  { %v1429_v13 = vsel %vm1014_vm13, %v1382_v11, %v1428_v4  ;;  %v1317_v14 = vpop.xlane.xlu0 %1316  ;;  %v1399_v8 = vrot.slane %v1320_v15, %v2144_v63  ;;  %v692_v11 = vld [vmem:[%s2439_s10] sm:$0xff] }
 0x3de   :  { %v1395_v16 = vrot.slane %v1317_v14, %v2142_v61  ;;  %vm919_vm5 = vcmp.gt.f32.partialorder %v692_v11, 0.0 }
 0x3e0   :  { %v1400_v17 = vsel %vm947_vm11, %v1399_v8, %v1395_v16  ;;  %v882_v19 = vpop.xlane.xlu1 %881 }
 0x3e1   :  { %v879_v18 = vpop.xlane.xlu0 %878  ;;  %v956_v23 = vrot.slane %v882_v19, %v2144_v63 }
 0x3e2   :  { %v952_v20 = vrot.slane %v879_v18, %v2142_v61  ;;  %v693_v18 = vld [vmem:[%s2439_s10 + $0x8] sm:$0xff] }
 0x3e3   :  { %vm1339_vm6 = vcmp.gt.f32.partialorder %v693_v18, 0.0 }
 0x3e4   :  { %v957_v24 = vsel %vm947_vm11, %v956_v23, %v952_v20  ;;  %v888_v6 = vpop.xlane.xlu1 %887 }
 0x3e5   :  { %v1013_v12 = vsel %vm1012_vm12, %v957_v24, %v948_v59  ;;  %v885_v27 = vpop.xlane.xlu0 %884  ;;  %v965_v40 = vrot.slane %v888_v6, %v2144_v63 }
 0x3e6   :  { %v961_v37 = vrot.slane %v885_v27, %v2142_v61 }
 0x3e8   :  { %v966_v26 = vsel %vm947_vm11, %v965_v40, %v961_v37  ;;  %v900_v33 = vpop.xlane.xlu1 %899 }
 0x3e9   :  { %v1015_v29 = vsel %vm1014_vm13, %v966_v26, %v1013_v12  ;;  %v897_v32 = vpop.xlane.xlu0 %896  ;;  %v983_v35 = vrot.slane %v900_v33, %v2144_v63 }
 0x3ea   :  { %v979_v34 = vrot.slane %v897_v32, %v2142_v61 }
 0x3ec   :  { %v984_v38 = vsel %vm947_vm11, %v983_v35, %v979_v34  ;;  %v1314_v31 = vpop.xlane.xlu1 %1313 }
 0x3ed   :  { %v1311_v39 = vpop.xlane.xlu0 %1310  ;;  %v1390_v42 = vrot.slane %v1314_v31, %v2144_v63 }
 0x3ee   :  { %v1386_v41 = vrot.slane %v1311_v39, %v2142_v61 }
 0x3f0   :  { %v1391_v43 = vsel %vm947_vm11, %v1390_v42, %v1386_v41  ;;  %v1326_v48 = vpop.xlane.xlu1 %1325 }
 0x3f1   :  { %v1430_v44 = vsel %vm1016_vm14, %v1391_v43, %v1429_v13  ;;  %v1323_v47 = vpop.xlane.xlu0 %1322  ;;  %v1408_v50 = vrot.slane %v1326_v48, %v2144_v63 }
 0x3f2   :  { %v1404_v49 = vrot.slane %v1323_v47, %v2142_v61  ;;  %v1431_v46 = vsel %vm1018_vm15, %v1400_v17, %v1430_v44  ;;  %v1888_v44 = vmov 0.0  }
 0x3f3   :  { %1723 = vmatprep.mubr.msk.f32.mxu1 %vm1887_vm7, %v1888_v44 }
 0x3f4   :  { %v1409_v51 = vsel %vm947_vm11, %v1408_v50, %v1404_v49  ;;  %v1332_v52 = vpop.xlane.xlu1 %1331 }
 0x3f5   :  { %v1329_v28 = vpop.xlane.xlu0 %1328  ;;  %v1432_v0 = vsel %vm1020_vm2, %v1409_v51, %v1431_v46  ;;  %v1417_v22 = vrot.slane %v1332_v52, %v2144_v63 }
 0x3f6   :  { %v1413_v1 = vrot.slane %v1329_v28, %v2142_v61 }
 0x3f8   :  { %v1418_v36 = vsel %vm947_vm11, %v1417_v22, %v1413_v1  ;;  %v894_v53 = vpop.xlane.xlu1 %893 }
 0x3f9   :  { %v891_v25 = vpop.xlane.xlu0 %890  ;;  %v1433_v54 = vsel %vm1022_vm3, %v1418_v36, %v1432_v0  ;;  %v974_v56 = vrot.slane %v894_v53, %v2144_v63  ;;  %v1566_v0 = vld [vmem:[%s2440_s11] ss:$0 sm:$0xff] }
 0x3fa   :  { %v970_v55 = vrot.slane %v891_v25, %v2142_v61 }
 0x3fc   :  { %v975_v57 = vsel %vm947_vm11, %v974_v56, %v970_v55  ;;  %v906_v59 = vpop.xlane.xlu1 %905 }
 0x3fd   :  { %v1017_v45 = vsel %vm1016_vm14, %v975_v57, %v1015_v29  ;;  %v903_v58 = vpop.xlane.xlu0 %902  ;;  %v992_v62 = vrot.slane %v906_v59, %v2144_v63 }
 0x3fe   :  { %v988_v60 = vrot.slane %v903_v58, %v2142_v61  ;;  %v1019_v2 = vsel %vm1018_vm15, %v984_v38, %v1017_v45 }
 0x400   :  { %v993_v3 = vsel %vm947_vm11, %v992_v62, %v988_v60  ;;  %v912_v4 = vpop.xlane.xlu1 %911 }
 0x401   :  { %v909_v30 = vpop.xlane.xlu0 %908  ;;  %v1021_v5 = vsel %vm1020_vm2, %v993_v3, %v1019_v2  ;;  %v1001_v7 = vrot.slane %v912_v4, %v2144_v63 }
 0x402   :  { %v997_v21 = vrot.slane %v909_v30, %v2142_v61 }
 0x404   :  { %v1002_v9 = vsel %vm947_vm11, %v1001_v7, %v997_v21  ;;  %v918_v14 = vpop.xlane.xlu1 %917 }
 0x405   :  { %v915_v13 = vpop.xlane.xlu0 %914  ;;  %v1023_v15 = vsel %vm1022_vm3, %v1002_v9, %v1021_v5  ;;  %v1010_v8 = vrot.slane %v918_v14, %v2144_v63 }
 0x406   :  { %v1006_v16 = vrot.slane %v915_v13, %v2142_v61 }
 0x408   :  { %v1011_v17 = vsel %vm947_vm11, %v1010_v8, %v1006_v16  ;;  %v1338_v20 = vpop.xlane.xlu1 %1337 }
 0x409   :  { %v1335_v19 = vpop.xlane.xlu0 %1334  ;;  %v1025_v23 = vsel %vm1024_vm4, %v1011_v17, %v1023_v15  ;;  %v1426_v12 = vrot.slane %v1338_v20, %v2144_v63 }
 0x40a   :  { %v1422_v24 = vrot.slane %v1335_v19, %v2142_v61  ;;  %v1027_v27 = vsel %vm919_vm5, %v1025_v23, -1e+30 }
 0x40b   :  { %v1028_v6 = vsel %vm60_vm0, %v1027_v27, -inf }
 0x40c   :  { %1029 = vmax.xlane.f32.xlu0 %v1028_v6  ;;  %v1427_v37 = vsel %vm947_vm11, %v1426_v12, %v1422_v24 }
 0x40d   :  { %v1434_v40 = vsel %vm1024_vm4, %v1427_v37, %v1433_v54 }
 0x40e   :  { %v1436_v26 = vsel %vm1339_vm6, %v1434_v40, -1e+30 }
 0x40f   :  { %v1437_v29 = vsel %vm60_vm0, %v1436_v26, -inf }
 0x410   :  { %1438 = vmax.xlane.f32.xlu1 %v1437_v29 }
 0x499   :  { %v1030_v32 = vpop.xlane.xlu0 %1029 }
 0x49a   :  { %v1031_v33 = vsub.f32 %v1027_v27, %v1030_v32 }
 0x49c   :  { %v1032_v34 = vmul.f32 1.442695, %v1031_v33 }
 0x49d   :  { %v1439_v61 = vpop.xlane.xlu1 %1438 }
 0x49e   :  { %1846 = vpow2.f32 %v1032_v34  ;;  %v1440_v63 = vsub.f32 %v1436_v26, %v1439_v61 }
 0x4a0   :  { %v1441_v35 = vmul.f32 1.442695, %v1440_v63 }
 0x4a2   :  { %1848 = vpow2.f32 %v1441_v35 }
 0x4a8   :  { %v1847_v38 = vpop.eup %1846 }
 0x4a9   :  { %v1034_v39 = vsel %vm919_vm5, %v1847_v38, 0.0 }
 0x4aa   :  { %v1035_v31 = vsel %vm60_vm0, %v1034_v39, 0.0 }
 0x4ab   :  { %1036 = vadd.xlane.f32.xlu0 %v1035_v31 }
 0x4ac   :  { %v1849_v41 = vpop.eup %1848 }
 0x4ad   :  { %v1443_v42 = vsel %vm1339_vm6, %v1849_v41, 0.0 }
 0x4ae   :  { %v1444_v43 = vsel %vm60_vm0, %v1443_v42, 0.0 }
 0x4af   :  { %1445 = vadd.xlane.f32.xlu1 %v1444_v43 }
 0x538   :  { %v1037_v47 = vpop.xlane.xlu0 %1036 }
 0x539   :  { %v1038_v48 = vmax.f32 %v1037_v47, 1e-20 }
 0x53b   :  { %1850 = vrcp.f32 %v1038_v48 }
 0x53c   :  { %v1446_v49 = vpop.xlane.xlu1 %1445 }
 0x53d   :  { %v1447_v50 = vmax.f32 %v1446_v49, 1e-20 }
 0x53f   :  { %1852 = vrcp.f32 %v1447_v50 }
 0x545   :  { %v1851_v46 = vpop.eup %1850 }
 0x546   :  { %v1040_v51 = vmul.f32 %v1851_v46, %v1034_v39 }
 0x548   :  { %1724 = vmatmul.mubr.msk.f32.vlgmr.msra.gmra.mrb[2].mxu1 %vm60_vm0, %v1040_v51 }
 0x549   :  { %v1853_v28 = vpop.eup %1852  ;;  %1794 = vmatpush3.bf16.msra.mxu1 %v2155_v10  ;;  %1730 = vmatprep.mubr.msk.f32.mxu1 %vm1887_vm7, %v1888_v44 }
 0x54a   :  { %v1449_v52 = vmul.f32 %v1853_v28, %v1443_v42 }
 0x54c   :  { %1731 = vmatmul.mubr.msk.f32.vlgmr.msra.gmra.mrb[4].mxu1 %vm60_vm0, %v1449_v52 }
 0x61b   :  { %v1116_v1 = vpop.f32.mrb[2].mxu1 }
 0x61c   :  { %v1117_v22 = vadd.f32 %v1566_v0, %v1116_v1  ;;  %v1725_v36 = vpop.f32.mrb[3].mxu1 }
 0x61e   :  { %1120 = vst.msk [vmem:[#allocation2] sm:$0xff] %vm312_vm1, %v1117_v22 }
 0x61f   :  { %v1519_v25 = vpop.f32.mrb[4].mxu1 }
 0x620   :  { %v1520_v53 = vadd.f32 %v1566_v0, %v1519_v25  ;;  %v1732_v54 = vpop.f32.mrb[5].mxu1 }
 0x622   :  { %1523 = vst.msk [vmem:[#allocation2 + $0x8] sm:$0xff] %vm312_vm1, %v1520_v53 }
 0x623   :  { %1865 = shalt.err (!%p1862_p4)
}
 0x624   :  { %s1866_s25 = scalar_lea.hbm %s2441_s12, 256 }
 0x625   :  { %p1867_p5 = scmp.ne.s32.totalorder %s2441_s12, %s1866_s25  ;;  %p1870_p6 = scmp.lt.u32.totalorder %s1866_s25, %s2441_s12 }
 0x627   :  { %p1872_p7 = pnand %p1870_p6, %p1867_p5 }
 0x629   :  { %1875 = shalt.err (!%p1872_p7)
}
 0x62a   :  { %s1890_s28 = smov 128   ;;  %s1891_s29 = smov 8  }
 0x62b   :  { %1535 = dma.vmem_to_hbm [thread:$0]  %s1530_s3, 256, %s2441_s12, [#allocation3], %s1890_s28, %s1890_s28, %s1891_s29  }
 0x62c   :  { %1876 = dma.done.wait [#allocation3], 256  }
 0x62d   :  { %1877 = vsyncadd [#allocation3], 4294967040 }
 0x62e   :  { %1539 = vsyncpa [#allocation3], 1 }

</bundles_post_ra>
